<compile_context>
chip_gen: v7x
topology: tpu7x:2x2x1
jax: 0.10.0
libtpu: 0.0.40
codegen_flags: <defaults>
</compile_context>

<pallas_src>
import functools

import jax
import jax.numpy as jnp
from jax.experimental import pallas as pl
from jax.experimental.pallas import tpu as pltpu


def _round_up(v, m):
    return (v + m - 1) // m * m


# Sublane packing granule by element size (f32 -> 8, bf16 -> 16, int8/fp8 -> 32).
_SUBLANE = {4: 8, 2: 16, 1: 32}


def _vmem_budget_bytes():
    """(physical, budget): ~85% of per-core VMEM, leaving compiler headroom."""
    physical = 64 * 2**20  # conservative fallback (v7x per-TC size)
    try:
        physical = int(pltpu.get_tpu_info().vmem_capacity_bytes)
    except Exception:
        pass
    budget = min(int(physical * 0.85), physical - 8 * 2**20)
    return physical, budget


def _select_tiles(m, in_pad, k_pad, out_pad, x_isz, w_isz, granule, budget,
                  tile_m_cap, tile_n_cap):
    """Pick (tile_m, tile_n). Prefer a single full-width N tile; shrink N only
    when the (tile_m, out_pad) output tile + weights genuinely break VMEM."""
    o_isz = x_isz
    tile_n = out_pad if tile_n_cap is None else min(out_pad, _round_up(tile_n_cap, 128))
    while True:
        fixed = (2 * in_pad * k_pad * w_isz        # weight_r (double-buffered)
                 + 2 * k_pad * tile_n * w_isz      # weight_l tile
                 + 2 * 8 * tile_n * 4)             # bias tile (sublane-padded)
        per_row = (2 * in_pad * x_isz              # x tile (double-buffered)
                   + 2 * tile_n * o_isz            # output tile (double-buffered)
                   + k_pad * 4)                    # h scratch (single, f32)
        max_rows = (budget - fixed) // per_row
        if max_rows >= granule or tile_n <= 128:
            break
        tile_n = max(128, _round_up(tile_n // 2, 128))

    # Largest power-of-two multiple of the sublane granule that fits.
    limit = max(granule, min(max_rows, tile_m_cap, _round_up(m, granule)))
    tile_m = granule
    while tile_m * 2 <= limit:
        tile_m *= 2
    # Keep >= 2 blocks along the "parallel" M axis when m allows it (v7x has
    # 2 TensorCores; on 1-TC parts this costs at most one extra grid step).
    tile_m = max(granule, min(tile_m, _round_up(-(-m // 2), granule)))
    return tile_m, tile_n


def _decomposed_linear_kernel(x_ref, wr_ref, wl_ref, b_ref, o_ref, h_ref, *, precise_h):
    # x_ref:  (tile_m, in_pad)     streamed input rows
    # wr_ref: (in_pad, k_pad)      pre-transposed weight_r (grid-invariant)
    # wl_ref: (k_pad, tile_n)      pre-transposed weight_l tile (resident along M)
    # b_ref:  (1, tile_n)          bias tile
    # o_ref:  (tile_m, tile_n)     output tile
    # h_ref:  (tile_m, k_pad) f32  scratch: x @ wr for the current M block,
    #                              computed once per M block and reused for all j.
    @pl.when(pl.program_id(1) == 0)
    def _():
        h_ref[...] = jnp.dot(x_ref[...], wr_ref[...],
                             preferred_element_type=jnp.float32)

    wl = wl_ref[...]
    if precise_h or wl.dtype == jnp.float32:
        h = h_ref[...]
        if wl.dtype != jnp.float32:
            wl = wl.astype(jnp.float32)
    else:
        # Optional faster path: feed matmul2 in the weights' native dtype
        # (truncates matmul1's f32 accumulation -- off by default).
        h = h_ref[...].astype(wl.dtype)

    y = jnp.dot(h, wl, preferred_element_type=jnp.float32)
    o_ref[...] = (y + b_ref[...].astype(jnp.float32)).astype(o_ref.dtype)


@functools.partial(jax.jit,
                   static_argnames=("tile_m", "tile_n", "force_pallas", "precise_h"))
def decomposed_linear(x, weight_l, weight_r, bias=None, *,
                      tile_m=None, tile_n=None, force_pallas=False, precise_h=True):
    """x: (..., in_features) -> (..., out_features).

    tile_m / tile_n are optional caps; by default tiles are derived from the
    per-generation VMEM budget (queried at trace time).
    """
    in_features = x.shape[-1]
    out_features, k = weight_l.shape
    assert weight_r.shape == (k, in_features)

    lead_shape = x.shape[:-1]
    x2d = x.reshape(-1, in_features)
    m = x2d.shape[0]

    # Small-problem fast path: padding copies + per-call/per-step kernel
    # overhead dominate below this threshold on every TPU generation.
    if not force_pallas and m * out_features * k < 1_000_000:
        y = (x2d @ weight_r.T) @ weight_l.T
        if bias is not None:
            y = y + bias
        return y.astype(x.dtype).reshape(*lead_shape, out_features)

    x_isz = jnp.dtype(x.dtype).itemsize
    w_isz = jnp.dtype(weight_l.dtype).itemsize
    granule = _SUBLANE.get(x_isz, 8)

    in_pad = _round_up(in_features, 128)
    k_pad = _round_up(k, 128)          # lane-width k: dense h vregs / wl sublanes
    out_pad = _round_up(out_features, 128)

    physical, budget = _vmem_budget_bytes()
    tile_m_eff, tile_n_eff = _select_tiles(
        m, in_pad, k_pad, out_pad, x_isz, w_isz, granule, budget,
        tile_m_cap=_round_up(tile_m, granule) if tile_m else 2048,
        tile_n_cap=tile_n)

    m_pad = _round_up(m, tile_m_eff)
    out_pad = _round_up(out_pad, tile_n_eff)
    grid = (m_pad // tile_m_eff, out_pad // tile_n_eff)

    # Pre-transpose + zero-pad weights/bias once in XLA (not per grid step).
    # Zero padding is mathematically exact.
    if in_pad == in_features and k_pad == k:
        wr_t = weight_r.T
    else:
        wr_t = (jnp.zeros((in_pad, k_pad), weight_r.dtype)
                .at[:in_features, :k].set(weight_r.T))
    if k_pad == k and out_pad == out_features:
        wl_t = weight_l.T
    else:
        wl_t = (jnp.zeros((k_pad, out_pad), weight_l.dtype)
                .at[:k, :out_features].set(weight_l.T))
    if bias is None:
        b2d = jnp.zeros((1, out_pad), jnp.float32)
    elif out_pad == out_features:
        b2d = bias.reshape(1, out_features)
    else:
        b2d = jnp.zeros((1, out_pad), bias.dtype).at[0, :out_features].set(bias)

    # Skip the activation padding copy when already aligned (the kernel is
    # HBM-bound; a padded copy is an extra full read+write of x).
    if m_pad == m and in_pad == in_features:
        x_p = x2d
    else:
        x_p = jnp.zeros((m_pad, in_pad), x.dtype).at[:m, :in_features].set(x2d)

    flops = 2 * m * in_features * k + 2 * m * k * out_features
    bytes_accessed = (x2d.size * x_isz
                      + weight_r.size * w_isz
                      + weight_l.size * w_isz
                      + out_features * 4
                      + m * out_features * x_isz)
    cost = pl.CostEstimate(flops=int(flops), transcendentals=0,
                           bytes_accessed=int(bytes_accessed))

    kernel = functools.partial(_decomposed_linear_kernel, precise_h=precise_h)
    vmem_limit = int(min(physical - 2 * 2**20, max(budget, 32 * 2**20)))

    out = pl.pallas_call(
        kernel,
        out_shape=jax.ShapeDtypeStruct((m_pad, out_pad), x.dtype),
        grid=grid,
        in_specs=[
            pl.BlockSpec((tile_m_eff, in_pad), lambda i, j: (i, 0)),
            pl.BlockSpec((in_pad, k_pad), lambda i, j: (0, 0)),
            pl.BlockSpec((k_pad, tile_n_eff), lambda i, j: (0, j)),
            pl.BlockSpec((1, tile_n_eff), lambda i, j: (0, j)),
        ],
        out_specs=pl.BlockSpec((tile_m_eff, tile_n_eff), lambda i, j: (i, j)),
        scratch_shapes=[pltpu.VMEM((tile_m_eff, k_pad), jnp.float32)],
        compiler_params=pltpu.CompilerParams(
            dimension_semantics=("parallel", "arbitrary"),
            vmem_limit_bytes=vmem_limit,
        ),
        cost_estimate=cost,
    )(x_p, wr_t, wl_t, b2d)

    if m_pad != m or out_pad != out_features:
        out = out[:m, :out_features]
    return out.reshape(*lead_shape, out_features)


if __name__ == "__main__":
    # Small shapes consistent with DecomposedLinear(in_features=32, out_features=32, k=8)
    batch, seq = 2, 8
    in_features, out_features, k = 32, 32, 8

    key = jax.random.PRNGKey(0)
    kx, kl, kr, kb = jax.random.split(key, 4)

    x = jax.random.normal(kx, (batch, seq, in_features), dtype=jnp.float32)
    weight_l = jax.random.uniform(kl, (out_features, k), dtype=jnp.float32,
                                  minval=-1.0 / (k ** 0.5), maxval=1.0 / (k ** 0.5))
    weight_r = jax.random.uniform(kr, (k, in_features), dtype=jnp.float32,
                                  minval=-1.0 / (in_features ** 0.5),
                                  maxval=1.0 / (in_features ** 0.5))
    bias = jax.random.uniform(kb, (out_features,), dtype=jnp.float32,
                              minval=-1.0 / (in_features ** 0.5),
                              maxval=1.0 / (in_features ** 0.5))

    ref = (x @ weight_r.T) @ weight_l.T + bias

    # 1) Pallas path (tiny shapes would normally take the XLA fast path).
    y = jax.block_until_ready(
        decomposed_linear(x, weight_l, weight_r, bias, force_pallas=True))
    assert y.shape == (batch, seq, out_features)
    assert jnp.allclose(y, ref, atol=1e-4, rtol=1e-4), "mismatch vs reference (bias)"

    # 2) Pallas path, no bias.
    y2 = jax.block_until_ready(
        decomposed_linear(x, weight_l, weight_r, None, force_pallas=True))
    ref2 = (x @ weight_r.T) @ weight_l.T
    assert jnp.allclose(y2, ref2, atol=1e-4, rtol=1e-4), "mismatch vs reference (no bias)"

    # 3) Default entry (small-problem fast path).
    y3 = jax.block_until_ready(decomposed_linear(x, weight_l, weight_r, bias))
    assert jnp.allclose(y3, ref, atol=1e-4, rtol=1e-4), "mismatch vs reference (fast path)"

    # 4) Lane-aligned shapes -> exercises the padding-copy-elision path.
    xb = jax.random.normal(kx, (4, 16, 128), dtype=jnp.float32)
    wl2 = 0.1 * jax.random.normal(kl, (128, 8), dtype=jnp.float32)
    wr2 = 0.1 * jax.random.normal(kr, (8, 128), dtype=jnp.float32)
    b2 = 0.1 * jax.random.normal(kb, (128,), dtype=jnp.float32)
    y4 = jax.block_until_ready(decomposed_linear(xb, wl2, wr2, b2, force_pallas=True))
    ref4 = (xb @ wr2.T) @ wl2.T + b2
    assert jnp.allclose(y4, ref4, atol=2e-3, rtol=2e-3), "mismatch vs reference (aligned)"

    print("KERNEL_OK")
</pallas_src>

<mosaic_0001>
module attributes {stable_mosaic.version = 11 : i64} {
  func.func @_decomposed_linear_kernel(%arg0: i32, %arg1: i32, %arg2: memref<8x128xf32, #tpu.memory_space<vmem>>, %arg3: memref<128x128xf32, #tpu.memory_space<vmem>>, %arg4: memref<128x128xf32, #tpu.memory_space<vmem>>, %arg5: memref<1x128xf32, #tpu.memory_space<vmem>>, %arg6: memref<8x128xf32, #tpu.memory_space<vmem>>, %arg7: memref<8x128xf32, #tpu.memory_space<vmem>>) attributes {dimension_semantics = [#tpu.dimension_semantics<parallel>, #tpu.dimension_semantics<arbitrary>], iteration_bounds = array<i64: 2, 1>, scalar_prefetch = 0 : i64, scratch_operands = 1 : i64, tpu.core_type = #tpu.core_type<tc>, window_params = [{transform_indices = @transform_0, window_bounds = array<i64: 8, 128>}, {pipeline_mode = #tpu.pipeline_mode<synchronous>, transform_indices = @transform_1, window_bounds = array<i64: 128, 128>}, {transform_indices = @transform_2, window_bounds = array<i64: 128, 128>}, {transform_indices = @transform_3, window_bounds = array<i64: 1, 128>}, {transform_indices = @transform_4, window_bounds = array<i64: 8, 128>}]} {
    %c0_i32 = arith.constant 0 : i32
    %0 = arith.cmpi eq, %arg1, %c0_i32 : i32
    %1 = arith.extui %0 : i1 to i32
    %c0_i32_0 = arith.constant 0 : i32
    %2 = arith.cmpi ne, %1, %c0_i32_0 : i32
    scf.if %2 {
      %c0_8 = arith.constant 0 : index
      %c0_9 = arith.constant 0 : index
      %10 = vector.load %arg2[%c0_8, %c0_9] : memref<8x128xf32, #tpu.memory_space<vmem>>, vector<8x128xf32>
      %c0_10 = arith.constant 0 : index
      %c0_11 = arith.constant 0 : index
      %11 = vector.load %arg3[%c0_10, %c0_11] : memref<128x128xf32, #tpu.memory_space<vmem>>, vector<128x128xf32>
      %cst_12 = arith.constant dense<0.000000e+00> : vector<8x128xf32>
      %12 = tpu.matmul %10, %11, %cst_12 {dimension_numbers = #tpu.dot_dimension_numbers<[1], [0], [0], [1], [0, 0, 1, 1], [], []>} : vector<8x128xf32>, vector<128x128xf32>, vector<8x128xf32> -> vector<8x128xf32>
      %c0_13 = arith.constant 0 : index
      %c0_14 = arith.constant 0 : index
      %13 = vector.load %arg7[%c0_13, %c0_14] : memref<8x128xf32, #tpu.memory_space<vmem>>, vector<8x128xf32>
      tpu.vector_store %arg7[%c0_13, %c0_14], %12 {strides = array<i32>} : memref<8x128xf32, #tpu.memory_space<vmem>>, vector<8x128xf32>,
    } else {
    }
    %c0 = arith.constant 0 : index
    %c0_1 = arith.constant 0 : index
    %3 = vector.load %arg4[%c0, %c0_1] : memref<128x128xf32, #tpu.memory_space<vmem>>, vector<128x128xf32>
    %c0_2 = arith.constant 0 : index
    %c0_3 = arith.constant 0 : index
    %4 = vector.load %arg7[%c0_2, %c0_3] : memref<8x128xf32, #tpu.memory_space<vmem>>, vector<8x128xf32>
    %cst = arith.constant dense<0.000000e+00> : vector<8x128xf32>
    %5 = tpu.matmul %4, %3, %cst {dimension_numbers = #tpu.dot_dimension_numbers<[1], [0], [0], [1], [0, 0, 1, 1], [], []>} : vector<8x128xf32>, vector<128x128xf32>, vector<8x128xf32> -> vector<8x128xf32>
    %c0_4 = arith.constant 0 : index
    %c0_5 = arith.constant 0 : index
    %6 = vector.load %arg5[%c0_4, %c0_5] : memref<1x128xf32, #tpu.memory_space<vmem>>, vector<1x128xf32>
    %7 = vector.broadcast %6 : vector<1x128xf32> to vector<8x128xf32>
    %8 = arith.addf %5, %7 : vector<8x128xf32>
    %c0_6 = arith.constant 0 : index
    %c0_7 = arith.constant 0 : index
    %9 = vector.load %arg6[%c0_6, %c0_7] : memref<8x128xf32, #tpu.memory_space<vmem>>, vector<8x128xf32>
    tpu.vector_store %arg6[%c0_6, %c0_7], %8 {strides = array<i32>} : memref<8x128xf32, #tpu.memory_space<vmem>>, vector<8x128xf32>,
    return
  }
  func.func @transform_0(%arg0: i32, %arg1: i32) -> (i32, i32) {
    %c0_i32 = arith.constant 0 : i32
    %c0_i32_0 = arith.constant 0 : i32
    return %arg0, %c0_i32 : i32, i32
  }
  func.func @transform_1(%arg0: i32, %arg1: i32) -> (i32, i32) {
    %c0_i32 = arith.constant 0 : i32
    %c0_i32_0 = arith.constant 0 : i32
    %c0_i32_1 = arith.constant 0 : i32
    return %c0_i32, %c0_i32_0 : i32, i32
  }
  func.func @transform_2(%arg0: i32, %arg1: i32) -> (i32, i32) {
    %c0_i32 = arith.constant 0 : i32
    %c0_i32_0 = arith.constant 0 : i32
    return %c0_i32, %arg1 : i32, i32
  }
  func.func @transform_3(%arg0: i32, %arg1: i32) -> (i32, i32) {
    %c0_i32 = arith.constant 0 : i32
    %c0_i32_0 = arith.constant 0 : i32
    return %c0_i32, %arg1 : i32, i32
  }
  func.func @transform_4(%arg0: i32, %arg1: i32) -> (i32, i32) {
    %c0_i32 = arith.constant 0 : i32
    return %arg0, %arg1 : i32, i32
  }
}

</mosaic_0001>

<bundles_post_ra>
// kernel: decomposed_linear.1
= control target key start
LH: loop header
LB: loop body
LE: loop exit
PB: predicated region body
PF: predicated region fallthrough
CT: control target
= control target key end

     0   :  { %s773_s15 = smov 0   ;;  %s775_s16 = smov 0   ;;  %s928_s0 = inlined_call_operand.vmem [shape: f32[16,128], index: 0, kind: input, shape index: {}]   ;;  %s929_s1 = inlined_call_operand.vmem [shape: f32[128,128], index: 1, kind: input, shape index: {}]   ;;  %s930_s2 = inlined_call_operand.vmem [shape: f32[128,128], index: 2, kind: input, shape index: {}]   ;;  %s931_s3 = inlined_call_operand.vmem [shape: f32[1,128], index: 3, kind: input, shape index: {}]   ;;  %s932_s4 = inlined_call_operand.vmem [shape: f32[16,128], index: 4, kind: output, shape index: {}]  }
   0x1   :  { %s777_s17 = smov 0  }
   0x2 LB: > { %s26_s18 = sadd.s32 1, %s739_s16  ;;  %p536_p0 = scmp.ge.s32.totalorder %s743_s17, 1  ;;  %s743_s17 = sphi %s777_s17, %s14_s17   ;;  %s739_s16 = sphi %s775_s16, %s934_s16   ;;  %s735_s15 = sphi %s773_s15, %s933_s15  }
   0x3   : > { %p28_p1 = scmp.ge.s32.totalorder %s26_s18, 2  ;;  %p192_p2 = scmp.lt.s32.totalorder %s743_s17, 3 }
   0x5   : > { %s936_s18 = smov (%p28_p1, %s26_s18), 0  ;;  %p193_p3 = pnand %p536_p0, %p192_p2 }
   0x6   : > { %v249_v0 = vld [vmem:[%s929_s1] sm:$0xff] (!%p193_p3)  ;;  %v250_v1 = vld [vmem:[%s929_s1 + $0x8] sm:$0xff] (!%p193_p3)  ;;  %v251_v2 = vld [vmem:[%s929_s1 + $0x10] sm:$0xff] (!%p193_p3)  ;;  %v745_v3 = vmov (!%p193_p3), 0.0|0.0   ;;  %vm746_vm0 = vmmov (!%p193_p3), 0   ;;  %v747_v6 = vmov (!%p193_p3), 0.0  }
   0x7   : > { %196 = sbr.rel (%p193_p3) target bundleno = 467 (0x1d3), region = 36  ;;  %646 = vmatprep.subr.bf16.mxu0 (!%p193_p3), %v745_v3  ;;  %v647_v4 = vpack.c.bf16 (!%p193_p3), %v250_v1, %v249_v0  ;;  %v252_v5 = vld [vmem:[%s929_s1 + $0x18] sm:$0xff] (!%p193_p3)  ;;  %608 = vmatprep.mubr.msk.f32.mxu0 (!%p193_p3), %vm746_vm0, %v747_v6  ;;  %v253_v8 = vld [vmem:[%s929_s1 + $0x20] sm:$0xff] (!%p193_p3)  ;;  %v254_v9 = vld [vmem:[%s929_s1 + $0x28] sm:$0xff] (!%p193_p3)  ;;  %p226_p4 = scmp.lt.s32.totalorder (!%p193_p3), %s735_s15, 1 }
   0x8   : > { %670 = vmatprep.subr.bf16.mxu1 (!%p193_p3), %v745_v3  ;;  %643 = vmatprep.mubr.msk.f32.mxu1 (!%p193_p3), %vm746_vm0, %v747_v6  ;;  %v650_v7 = vpack.c.bf16 (!%p193_p3), %v252_v5, %v251_v2  ;;  %v336_v10 = vld [vmem:[%s930_s2] sm:$0xff] (!%p193_p3)  ;;  %v337_v11 = vld [vmem:[%s930_s2 + $0x8] sm:$0xff] (!%p193_p3)  ;;  %v338_v13 = vld [vmem:[%s930_s2 + $0x10] sm:$0xff] (!%p193_p3)  ;;  %v653_v15 = vpack.c.bf16 (!%p193_p3), %v254_v9, %v253_v8 }
   0x9   : > { %648 = vmatpush3.bf16.msra.mxu0 (!%p193_p3), %v647_v4  ;;  %v671_v12 = vpack.c.bf16 (!%p193_p3), %v337_v11, %v336_v10  ;;  %v339_v14 = vld [vmem:[%s930_s2 + $0x18] sm:$0xff] (!%p193_p3)  ;;  %v255_v16 = vld [vmem:[%s929_s1 + $0x30] sm:$0xff] (!%p193_p3)  ;;  %v340_v19 = vld [vmem:[%s930_s2 + $0x20] sm:$0xff] (!%p193_p3) }
   0xa   : > { %649 = vmatprep.subr.bf16.mxu0 (!%p193_p3), %v745_v3  ;;  %v256_v17 = vld [vmem:[%s929_s1 + $0x38] sm:$0xff] (!%p193_p3)  ;;  %v674_v18 = vpack.c.bf16 (!%p193_p3), %v339_v14, %v338_v13  ;;  %v341_v20 = vld [vmem:[%s930_s2 + $0x28] sm:$0xff] (!%p193_p3)  ;;  %v257_v22 = vld [vmem:[%s929_s1 + $0x40] sm:$0xff] (!%p193_p3) }
   0xb   : > { %672 = vmatpush3.bf16.msra.mxu1 (!%p193_p3), %v671_v12  ;;  %v656_v21 = vpack.c.bf16 (!%p193_p3), %v256_v17, %v255_v16  ;;  %v258_v23 = vld [vmem:[%s929_s1 + $0x48] sm:$0xff] (!%p193_p3)  ;;  %v677_v24 = vpack.c.bf16 (!%p193_p3), %v341_v20, %v340_v19  ;;  %v342_v25 = vld [vmem:[%s930_s2 + $0x30] sm:$0xff] (!%p193_p3)  ;;  %v343_v26 = vld [vmem:[%s930_s2 + $0x38] sm:$0xff] (!%p193_p3) }
   0xc   : > { %673 = vmatprep.subr.bf16.mxu1 (!%p193_p3), %v745_v3  ;;  %v659_v27 = vpack.c.bf16 (!%p193_p3), %v258_v23, %v257_v22  ;;  %v259_v28 = vld [vmem:[%s929_s1 + $0x50] sm:$0xff] (!%p193_p3)  ;;  %v260_v29 = vld [vmem:[%s929_s1 + $0x58] sm:$0xff] (!%p193_p3)  ;;  %v680_v30 = vpack.c.bf16 (!%p193_p3), %v343_v26, %v342_v25  ;;  %v344_v31 = vld [vmem:[%s930_s2 + $0x40] sm:$0xff] (!%p193_p3) }
   0xd   : > { %651 = vmatpush3.bf16.msra.mxu0 (!%p193_p3), %v650_v7  ;;  %v345_v32 = vld [vmem:[%s930_s2 + $0x48] sm:$0xff] (!%p193_p3)  ;;  %v662_v33 = vpack.c.bf16 (!%p193_p3), %v260_v29, %v259_v28  ;;  %v261_v34 = vld [vmem:[%s929_s1 + $0x60] sm:$0xff] (!%p193_p3)  ;;  %v346_v37 = vld [vmem:[%s930_s2 + $0x50] sm:$0xff] (!%p193_p3) }
   0xe   : > { %652 = vmatprep.subr.bf16.mxu0 %v745_v3  ;;  %v262_v35 = vld [vmem:[%s929_s1 + $0x68] sm:$0xff]  ;;  %v683_v36 = vpack.c.bf16 %v345_v32, %v344_v31  ;;  %s938_s15 = smov (!%p226_p4, %s735_s15), 1  ;;  %v347_v38 = vld [vmem:[%s930_s2 + $0x58] sm:$0xff]  ;;  %v263_v40 = vld [vmem:[%s929_s1 + $0x70] sm:$0xff] }
   0xf   : > { %675 = vmatpush3.bf16.msra.mxu1 %v674_v18  ;;  %v665_v39 = vpack.c.bf16 %v262_v35, %v261_v34  ;;  %v264_v41 = vld [vmem:[%s929_s1 + $0x78] sm:$0xff]  ;;  %v686_v42 = vpack.c.bf16 %v347_v38, %v346_v37  ;;  %s537_s5 = sshll.u32 %s938_s15, 3  ;;  %v348_v43 = vld [vmem:[%s930_s2 + $0x60] sm:$0xff]  ;;  %v349_v44 = vld [vmem:[%s930_s2 + $0x68] sm:$0xff] }
  0x10   : > { %676 = vmatprep.subr.bf16.mxu1 %v745_v3  ;;  %v668_v45 = vpack.c.bf16 %v264_v41, %v263_v40  ;;  %s229_s12 = scalar_lea.vmem %s928_s0, %s537_s5  ;;  %v689_v46 = vpack.c.bf16 %v349_v44, %v348_v43  ;;  %v350_v47 = vld [vmem:[%s930_s2 + $0x70] sm:$0xff]  ;;  %v351_v48 = vld [vmem:[%s930_s2 + $0x78] sm:$0xff]  ;;  %v539_v53 = vld [vmem:[%s931_s3] ss:$0 sm:$0xff]  ;;  %s243_s24 = scalar_lea.vmem %s932_s4, %s537_s5 }
  0x11   : > { %654 = vmatpush3.bf16.msra.mxu0 %v653_v15  ;;  %v248_v49 = vld [vmem:[%s229_s12] sm:$0xff]  ;;  %v692_v50 = vpack.c.bf16 %v351_v48, %v350_v47 }
  0x12   : > { %655 = vmatprep.subr.bf16.mxu0 %v745_v3 }
  0x13   : > { %678 = vmatpush3.bf16.msra.mxu1 %v677_v24 }
  0x14   : > { %679 = vmatprep.subr.bf16.mxu1 %v745_v3 }
  0x15   : > { %657 = vmatpush3.bf16.msra.mxu0 %v656_v21 }
  0x16   : > { %658 = vmatprep.subr.bf16.mxu0 %v745_v3 }
  0x17   : > { %681 = vmatpush3.bf16.msra.mxu1 %v680_v30 }
  0x18   : > { %682 = vmatprep.subr.bf16.mxu1 %v745_v3 }
  0x19   : > { %660 = vmatpush3.bf16.msra.mxu0 %v659_v27 }
  0x1a   : > { %661 = vmatprep.subr.bf16.mxu0 %v745_v3 }
  0x1b   : > { %684 = vmatpush3.bf16.msra.mxu1 %v683_v36 }
  0x1c   : > { %685 = vmatprep.subr.bf16.mxu1 %v745_v3 }
  0x1d   : > { %663 = vmatpush3.bf16.msra.mxu0 %v662_v33 }
  0x1e   : > { %664 = vmatprep.subr.bf16.mxu0 %v745_v3 }
  0x1f   : > { %687 = vmatpush3.bf16.msra.mxu1 %v686_v42 }
  0x20   : > { %688 = vmatprep.subr.bf16.mxu1 %v745_v3 }
  0x21   : > { %666 = vmatpush3.bf16.msra.mxu0 %v665_v39 }
  0x22   : > { %667 = vmatprep.subr.bf16.mxu0 %v745_v3 }
  0x23   : > { %690 = vmatpush3.bf16.msra.mxu1 %v689_v46 }
  0x24   : > { %691 = vmatprep.subr.bf16.mxu1 %v745_v3 }
  0x25   : > { %669 = vmatpush3.bf16.msra.mxu0 %v668_v45 }
  0x27   : > { %693 = vmatpush3.bf16.msra.mxu1 %v692_v50 }
  0x28   : > { %609 = vmatmul.mubr.f32.vlgmr.msra.gmra.mrb[0].mxu0 %v248_v49 }
  0xfb   : > { %v331_v51 = vpop.f32.mrb[0].mxu0 }
  0xfc   : > { %v610_v52 = vpop.f32.mrb[1].mxu0  ;;  %644 = vmatmul.mubr.f32.vlgmr.msra.gmra.mrb[0].mxu1 %v331_v51 }
 0x1cf   : > { %v426_v54 = vpop.f32.mrb[0].mxu1 }
 0x1d0   : > { %v427_v55 = vadd.f32 %v539_v53, %v426_v54  ;;  %v645_v56 = vpop.f32.mrb[1].mxu1 }
 0x1d2   : > { %430 = vst [vmem:[%s243_s24] sm:$0xff] %v427_v55 }
 0x1d3 PF: > { %s14_s17 = sadd.s32 1, %s743_s17   ;;  %s933_s15 = smov %s739_s16 }
 0x1d4   : > { %p11_p5 = scmp.ge.s32.totalorder %s14_s17, 4   ;;  %s934_s16 = smov %s936_s18 }
 0x1d6   :  { %13 = sbr.rel (!%p11_p5) target bundleno = 2 (0x2), region = 76 }

</bundles_post_ra>
